<compile_context>
chip_gen: v7x
topology: tpu7x:2x2x1
jax: 0.10.0
libtpu: 0.0.40
codegen_flags: <defaults>
</compile_context>

<pallas_src>
import functools

import jax
import jax.numpy as jnp
from jax import lax
from jax.experimental import pallas as pl
from jax.experimental.pallas import tpu as pltpu

EPS = 1e-5


def _vmem_limit_bytes():
    # Generation-aware scoped-VMEM budget: ~3/4 of physical VMEM, capped at 112 MiB.
    #   v5e / v6e (128 MiB) -> 96 MiB,   v7x (64 MiB per TensorCore) -> 48 MiB.
    try:
        cap = int(getattr(pltpu.get_tpu_info(), "vmem_capacity_bytes", 64 * 1024 * 1024))
    except Exception:  # interpret mode / unusual runtimes
        cap = 64 * 1024 * 1024
    return int(min((cap * 3) // 4, 112 * 1024 * 1024))


_VMEM_LIMIT = _vmem_limit_bytes()


def _pick_batch_block(N, C_in, C_out, L, ks, out_bytes, vmem_limit):
    """Largest divisor of N (<= 8) whose per-grid-step VMEM footprint fits the budget."""
    per_sample = (C_in * L * 4              # raw x block (f32 worst case)
                  + ks * C_in * L * 2       # stacked bf16 matmul operand
                  + C_out * L * 4           # f32 conv result
                  + C_out * L * out_bytes)  # output tile
    budget = vmem_limit // 6                # double-buffered in/out specs + weights + headroom
    cap = max(1, budget // max(per_sample, 1))
    cap = int(min(cap, 8, N))               # keep the static in-kernel sample loop short
    b_blk = 1
    for d in range(1, cap + 1):
        if N % d == 0:
            b_blk = d
    return b_blk


def _make_kernels(B_blk, C_in, C_out, L, ks, padding):
    """Build the two kernel bodies as closures over the static shapes."""

    def stacked_operand(xb):
        # xb: (C_in, L) bf16 -> (ks*C_in, L) bf16.  Row block k holds x shifted so that column l
        # reads x[:, l + k - padding] (zero outside [0, L)): the "same"-conv halo is built with
        # in-register lane shifts + zero edge columns, no pre-padded HBM array.
        parts = []
        for k in range(ks):                 # static unroll (ks tiny)
            d = k - padding
            if d == 0:
                parts.append(xb)
            elif d > 0:
                parts.append(jnp.concatenate(
                    [xb[:, d:], jnp.zeros((C_in, d), xb.dtype)], axis=1))
            else:
                parts.append(jnp.concatenate(
                    [jnp.zeros((C_in, -d), xb.dtype), xb[:, :L + d]], axis=1))
        return jnp.concatenate(parts, axis=0)

    def conv_block(x_ref, w_ref, b):
        # Single fused matmul with K = ks*C_in; f32 accumulation on the MXU.
        xs = stacked_operand(x_ref[b].astype(jnp.bfloat16))                 # (ks*C_in, L) bf16
        return jnp.dot(w_ref[...], xs, preferred_element_type=jnp.float32)  # (C_out, L) f32

    def stats_kernel(x_ref, w_ref, s_ref):
        # Pass 1: fused conv + BN partial stats accumulated in the resident (C_out, 2) output
        # block across the whole grid; written back to HBM exactly once.
        @pl.when(pl.program_id(0) == 0)
        def _init():
            s_ref[...] = jnp.zeros_like(s_ref)

        s_acc = jnp.zeros((C_out, 1), jnp.float32)
        ss_acc = jnp.zeros((C_out, 1), jnp.float32)
        for b in range(B_blk):              # static unroll, B_blk <= 8
            y = conv_block(x_ref, w_ref, b)
            s_acc = s_acc + jnp.sum(y, axis=1, keepdims=True)
            ss_acc = ss_acc + jnp.sum(y * y, axis=1, keepdims=True)
        s_ref[:, 0:1] += s_acc
        s_ref[:, 1:2] += ss_acc

    def norm_kernel(x_ref, w_ref, ss_ref, o_ref):
        # Pass 2: recompute the cheap (MXU) conv and apply the fused BN affine in f32; output is
        # emitted directly in NCL (lane axis = L).
        scale = ss_ref[:, 0:1]              # (C_out, 1), hoisted out of the sample loop
        shift = ss_ref[:, 1:2]
        for b in range(B_blk):
            y = conv_block(x_ref, w_ref, b)
            o_ref[b] = (y * scale + shift).astype(o_ref.dtype)

    return stats_kernel, norm_kernel


@functools.partial(jax.jit,
                   static_argnames=("stride", "padding", "dilation", "groups", "eps"))
def conv_bn_1d(x, weight, gamma, beta, *, stride=1, padding=1, dilation=1, groups=1, eps=EPS):
    """x: (N, C_in, L) NCL.  weight: (C_out, C_in, ks).  Returns (N, C_out, L) NCL."""
    N, C_in, L = x.shape
    C_out, _, ks = weight.shape
    # TODO(synk): stride/dilation/groups != 1 and non-"same" padding are not implemented
    #             (module defaults only); BatchNorm1d running_mean/running_var buffer updates
    #             (a training-state side effect) are not produced here.
    assert stride == 1 and dilation == 1 and groups == 1
    assert 2 * padding == ks - 1, "only 'same'-style Conv1d padding is supported"
    L_out = L

    # Weight reshaped once so the ks taps fold into a single K = ks*C_in contraction:
    # w2[o, k*C_in + c] = weight[o, c, k].
    w2 = jnp.transpose(weight, (0, 2, 1)).reshape(C_out, ks * C_in).astype(jnp.bfloat16)

    B_blk = _pick_batch_block(N, C_in, C_out, L, ks,
                              jnp.dtype(x.dtype).itemsize, _VMEM_LIMIT)
    G = N // B_blk

    stats_kernel, norm_kernel = _make_kernels(B_blk, C_in, C_out, L, ks, padding)

    x_spec = pl.BlockSpec((B_blk, C_in, L), lambda n: (n, 0, 0))
    w_spec = pl.BlockSpec((C_out, ks * C_in), lambda n: (0, 0))
    vec_spec = pl.BlockSpec((C_out, 2), lambda n: (0, 0))

    # --- pass 1: fused conv + global BN statistics (single resident accumulator block) --------
    stats = pl.pallas_call(
        stats_kernel,
        out_shape=jax.ShapeDtypeStruct((C_out, 2), jnp.float32),
        grid=(G,),
        in_specs=[x_spec, w_spec],
        out_specs=vec_spec,
        compiler_params=pltpu.CompilerParams(
            dimension_semantics=("arbitrary",), vmem_limit_bytes=_VMEM_LIMIT),
    )(x, w2)

    # --- tiny f32 epilogue: totals -> fused scale / shift (variance clamped at 0) -------------
    m = jnp.float32(N * L_out)
    mean = stats[:, 0] / m
    var = jnp.maximum(stats[:, 1] / m - mean * mean, 0.0)
    inv_std = lax.rsqrt(var + jnp.float32(eps))
    scale = gamma.astype(jnp.float32) * inv_std
    shift = beta.astype(jnp.float32) - mean * scale
    scale_shift = jnp.stack([scale, shift], axis=1)          # single (C_out, 2) operand

    # --- pass 2: fused conv + normalization; output emitted directly in NCL -------------------
    out = pl.pallas_call(
        norm_kernel,
        out_shape=jax.ShapeDtypeStruct((N, C_out, L_out), x.dtype),
        grid=(G,),
        in_specs=[x_spec, w_spec, vec_spec],
        out_specs=pl.BlockSpec((B_blk, C_out, L_out), lambda n: (n, 0, 0)),
        compiler_params=pltpu.CompilerParams(
            dimension_semantics=("parallel",), vmem_limit_bytes=_VMEM_LIMIT),
    )(x, w2, scale_shift)
    return out


def reference(x, weight, gamma, beta, *, padding=1, eps=EPS):
    # Pure-JAX reference.  Inputs are rounded to bf16 exactly like the kernel's matmul operands
    # (accumulation in f32), so the comparison isolates kernel correctness, not cast error.
    xc = x.astype(jnp.bfloat16).astype(jnp.float32)
    wc = weight.astype(jnp.bfloat16).astype(jnp.float32)
    feat = lax.conv_general_dilated(
        xc, wc, window_strides=(1,), padding=[(padding, padding)],
        dimension_numbers=("NCH", "OIH", "NCH"))
    mean = jnp.mean(feat, axis=(0, 2), keepdims=True)
    var = jnp.mean((feat - mean) ** 2, axis=(0, 2), keepdims=True)
    return (feat - mean) * lax.rsqrt(var + eps) * gamma.reshape(1, -1, 1) + beta.reshape(1, -1, 1)


if __name__ == "__main__":
    key = jax.random.PRNGKey(0)
    N, C_in, C_out, L, ks = 2, 4, 8, 16, 3

    kx, kw = jax.random.split(key)
    x = jax.random.normal(kx, (N, C_in, L), dtype=jnp.float32)
    weight = jax.random.normal(kw, (C_out, C_in, ks), dtype=jnp.float32) * 0.1
    gamma = jnp.ones((C_out,), dtype=jnp.float32)    # PyTorch BatchNorm1d default affine init
    beta = jnp.zeros((C_out,), dtype=jnp.float32)

    out = conv_bn_1d(x, weight, gamma, beta, stride=1, padding=1)
    out = jax.block_until_ready(out)

    ref = reference(x, weight, gamma, beta, padding=1)
    assert out.shape == (N, C_out, L)
    assert jnp.allclose(out, ref, atol=1e-3, rtol=1e-3), float(jnp.max(jnp.abs(out - ref)))

    print("KERNEL_OK")
</pallas_src>

<mosaic_0001>
module attributes {stable_mosaic.version = 11 : i64} {
  func.func @stats_kernel(%arg0: i32, %arg1: memref<2x4x16xf32, #tpu.memory_space<vmem>>, %arg2: memref<8x12xbf16, #tpu.memory_space<vmem>>, %arg3: memref<8x2xf32, #tpu.memory_space<vmem>>) attributes {dimension_semantics = [#tpu.dimension_semantics<arbitrary>], iteration_bounds = array<i64: 1>, scalar_prefetch = 0 : i64, scratch_operands = 0 : i64, tpu.core_type = #tpu.core_type<tc>, window_params = [{transform_indices = @transform_0, window_bounds = array<i64: 2, 4, 16>}, {pipeline_mode = #tpu.pipeline_mode<synchronous>, transform_indices = @transform_1, window_bounds = array<i64: 8, 12>}, {pipeline_mode = #tpu.pipeline_mode<synchronous>, transform_indices = @transform_2, window_bounds = array<i64: 8, 2>}]} {
    %c0_i32 = arith.constant 0 : i32
    %0 = arith.cmpi eq, %arg0, %c0_i32 : i32
    %1 = arith.extui %0 : i1 to i32
    %c0_i32_0 = arith.constant 0 : i32
    %2 = arith.cmpi ne, %1, %c0_i32_0 : i32
    scf.if %2 {
      %cst_28 = arith.constant 0.000000e+00 : f32
      %49 = vector.broadcast %cst_28 : f32 to vector<8x2xf32>
      %c0_29 = arith.constant 0 : index
      %c0_30 = arith.constant 0 : index
      %50 = vector.load %arg3[%c0_29, %c0_30] : memref<8x2xf32, #tpu.memory_space<vmem>>, vector<8x2xf32>
      tpu.vector_store %arg3[%c0_29, %c0_30], %49 {strides = array<i32>} : memref<8x2xf32, #tpu.memory_space<vmem>>, vector<8x2xf32>,
    } else {
    }
    %cst = arith.constant 0.000000e+00 : f32
    %3 = vector.broadcast %cst : f32 to vector<8x1xf32>
    %cst_1 = arith.constant 0.000000e+00 : f32
    %4 = vector.broadcast %cst_1 : f32 to vector<8x1xf32>
    %c0 = arith.constant 0 : index
    %c0_2 = arith.constant 0 : index
    %c0_3 = arith.constant 0 : index
    %5 = vector.load %arg1[%c0, %c0_2, %c0_3] : memref<2x4x16xf32, #tpu.memory_space<vmem>>, vector<1x4x16xf32>
    %6 = vector.shape_cast %5 : vector<1x4x16xf32> to vector<4x16xf32>
    %7 = arith.truncf %6 : vector<4x16xf32> to vector<4x16xbf16>
    %cst_4 = arith.constant 0.000000e+00 : bf16
    %8 = vector.broadcast %cst_4 : bf16 to vector<4x1xbf16>
    %9 = vector.extract_strided_slice %7 {offsets = [0, 0], sizes = [4, 15], strides = [1, 1]} : vector<4x16xbf16> to vector<4x15xbf16>
    %10 = tpu.concatenate %8, %9 in 1 : vector<4x1xbf16>, vector<4x15xbf16> -> vector<4x16xbf16>
    %11 = vector.extract_strided_slice %7 {offsets = [0, 1], sizes = [4, 15], strides = [1, 1]} : vector<4x16xbf16> to vector<4x15xbf16>
    %cst_5 = arith.constant 0.000000e+00 : bf16
    %12 = vector.broadcast %cst_5 : bf16 to vector<4x1xbf16>
    %13 = tpu.concatenate %11, %12 in 1 : vector<4x15xbf16>, vector<4x1xbf16> -> vector<4x16xbf16>
    %14 = tpu.concatenate %10, %7, %13 in 0 : vector<4x16xbf16>, vector<4x16xbf16>, vector<4x16xbf16> -> vector<12x16xbf16>
    %c0_6 = arith.constant 0 : index
    %c0_7 = arith.constant 0 : index
    %15 = vector.load %arg2[%c0_6, %c0_7] : memref<8x12xbf16, #tpu.memory_space<vmem>>, vector<8x12xbf16>
    %cst_8 = arith.constant dense<0.000000e+00> : vector<8x16xf32>
    %16 = tpu.matmul %15, %14, %cst_8 {dimension_numbers = #tpu.dot_dimension_numbers<[1], [0], [0], [1], [0, 0, 1, 1], [], []>} : vector<8x12xbf16>, vector<12x16xbf16>, vector<8x16xf32> -> vector<8x16xf32>
    %cst_9 = arith.constant dense<0.000000e+00> : vector<8xf32>
    %17 = vector.multi_reduction <add>, %16, %cst_9 [1] : vector<8x16xf32> to vector<8xf32>
    %18 = vector.shape_cast %17 : vector<8xf32> to vector<8x1xf32>
    %19 = arith.addf %3, %18 : vector<8x1xf32>
    %20 = arith.mulf %16, %16 : vector<8x16xf32>
    %cst_10 = arith.constant dense<0.000000e+00> : vector<8xf32>
    %21 = vector.multi_reduction <add>, %20, %cst_10 [1] : vector<8x16xf32> to vector<8xf32>
    %22 = vector.shape_cast %21 : vector<8xf32> to vector<8x1xf32>
    %23 = arith.addf %4, %22 : vector<8x1xf32>
    %c1 = arith.constant 1 : index
    %c0_11 = arith.constant 0 : index
    %c0_12 = arith.constant 0 : index
    %24 = vector.load %arg1[%c1, %c0_11, %c0_12] : memref<2x4x16xf32, #tpu.memory_space<vmem>>, vector<1x4x16xf32>
    %25 = vector.shape_cast %24 : vector<1x4x16xf32> to vector<4x16xf32>
    %26 = arith.truncf %25 : vector<4x16xf32> to vector<4x16xbf16>
    %cst_13 = arith.constant 0.000000e+00 : bf16
    %27 = vector.broadcast %cst_13 : bf16 to vector<4x1xbf16>
    %28 = vector.extract_strided_slice %26 {offsets = [0, 0], sizes = [4, 15], strides = [1, 1]} : vector<4x16xbf16> to vector<4x15xbf16>
    %29 = tpu.concatenate %27, %28 in 1 : vector<4x1xbf16>, vector<4x15xbf16> -> vector<4x16xbf16>
    %30 = vector.extract_strided_slice %26 {offsets = [0, 1], sizes = [4, 15], strides = [1, 1]} : vector<4x16xbf16> to vector<4x15xbf16>
    %cst_14 = arith.constant 0.000000e+00 : bf16
    %31 = vector.broadcast %cst_14 : bf16 to vector<4x1xbf16>
    %32 = tpu.concatenate %30, %31 in 1 : vector<4x15xbf16>, vector<4x1xbf16> -> vector<4x16xbf16>
    %33 = tpu.concatenate %29, %26, %32 in 0 : vector<4x16xbf16>, vector<4x16xbf16>, vector<4x16xbf16> -> vector<12x16xbf16>
    %c0_15 = arith.constant 0 : index
    %c0_16 = arith.constant 0 : index
    %34 = vector.load %arg2[%c0_15, %c0_16] : memref<8x12xbf16, #tpu.memory_space<vmem>>, vector<8x12xbf16>
    %cst_17 = arith.constant dense<0.000000e+00> : vector<8x16xf32>
    %35 = tpu.matmul %34, %33, %cst_17 {dimension_numbers = #tpu.dot_dimension_numbers<[1], [0], [0], [1], [0, 0, 1, 1], [], []>} : vector<8x12xbf16>, vector<12x16xbf16>, vector<8x16xf32> -> vector<8x16xf32>
    %cst_18 = arith.constant dense<0.000000e+00> : vector<8xf32>
    %36 = vector.multi_reduction <add>, %35, %cst_18 [1] : vector<8x16xf32> to vector<8xf32>
    %37 = vector.shape_cast %36 : vector<8xf32> to vector<8x1xf32>
    %38 = arith.addf %19, %37 : vector<8x1xf32>
    %39 = arith.mulf %35, %35 : vector<8x16xf32>
    %cst_19 = arith.constant dense<0.000000e+00> : vector<8xf32>
    %40 = vector.multi_reduction <add>, %39, %cst_19 [1] : vector<8x16xf32> to vector<8xf32>
    %41 = vector.shape_cast %40 : vector<8xf32> to vector<8x1xf32>
    %42 = arith.addf %23, %41 : vector<8x1xf32>
    %c0_20 = arith.constant 0 : index
    %c0_21 = arith.constant 0 : index
    %43 = vector.load %arg3[%c0_20, %c0_21] : memref<8x2xf32, #tpu.memory_space<vmem>>, vector<8x1xf32>
    %44 = arith.addf %43, %38 : vector<8x1xf32>
    %c0_22 = arith.constant 0 : index
    %c0_23 = arith.constant 0 : index
    %45 = vector.load %arg3[%c0_22, %c0_23] : memref<8x2xf32, #tpu.memory_space<vmem>>, vector<8x1xf32>
    tpu.vector_store %arg3[%c0_22, %c0_23], %44 {strides = array<i32>} : memref<8x2xf32, #tpu.memory_space<vmem>>, vector<8x1xf32>,
    %c0_24 = arith.constant 0 : index
    %c1_25 = arith.constant 1 : index
    %46 = vector.load %arg3[%c0_24, %c1_25] : memref<8x2xf32, #tpu.memory_space<vmem>>, vector<8x1xf32>
    %47 = arith.addf %46, %42 : vector<8x1xf32>
    %c0_26 = arith.constant 0 : index
    %c1_27 = arith.constant 1 : index
    %48 = vector.load %arg3[%c0_26, %c1_27] : memref<8x2xf32, #tpu.memory_space<vmem>>, vector<8x1xf32>
    tpu.vector_store %arg3[%c0_26, %c1_27], %47 {strides = array<i32>} : memref<8x2xf32, #tpu.memory_space<vmem>>, vector<8x1xf32>,
    return
  }
  func.func @transform_0(%arg0: i32) -> (i32, i32, i32) {
    %c0_i32 = arith.constant 0 : i32
    %c0_i32_0 = arith.constant 0 : i32
    %c0_i32_1 = arith.constant 0 : i32
    return %arg0, %c0_i32, %c0_i32_0 : i32, i32, i32
  }
  func.func @transform_1(%arg0: i32) -> (i32, i32) {
    %c0_i32 = arith.constant 0 : i32
    %c0_i32_0 = arith.constant 0 : i32
    %c0_i32_1 = arith.constant 0 : i32
    return %c0_i32, %c0_i32_0 : i32, i32
  }
  func.func @transform_2(%arg0: i32) -> (i32, i32) {
    %c0_i32 = arith.constant 0 : i32
    %c0_i32_0 = arith.constant 0 : i32
    %c0_i32_1 = arith.constant 0 : i32
    return %c0_i32, %c0_i32_0 : i32, i32
  }
}

module attributes {stable_mosaic.version = 11 : i64} {
  func.func @norm_kernel(%arg0: i32, %arg1: memref<2x4x16xf32, #tpu.memory_space<vmem>>, %arg2: memref<8x12xbf16, #tpu.memory_space<vmem>>, %arg3: memref<8x2xf32, #tpu.memory_space<vmem>>, %arg4: memref<2x8x16xf32, #tpu.memory_space<vmem>>) attributes {dimension_semantics = [#tpu.dimension_semantics<parallel>], iteration_bounds = array<i64: 1>, scalar_prefetch = 0 : i64, scratch_operands = 0 : i64, tpu.core_type = #tpu.core_type<tc>, window_params = [{transform_indices = @transform_0, window_bounds = array<i64: 2, 4, 16>}, {pipeline_mode = #tpu.pipeline_mode<synchronous>, transform_indices = @transform_1, window_bounds = array<i64: 8, 12>}, {pipeline_mode = #tpu.pipeline_mode<synchronous>, transform_indices = @transform_2, window_bounds = array<i64: 8, 2>}, {transform_indices = @transform_3, window_bounds = array<i64: 2, 8, 16>}]} {
    %c0 = arith.constant 0 : index
    %c0_0 = arith.constant 0 : index
    %0 = vector.load %arg3[%c0, %c0_0] : memref<8x2xf32, #tpu.memory_space<vmem>>, vector<8x1xf32>
    %c0_1 = arith.constant 0 : index
    %c1 = arith.constant 1 : index
    %1 = vector.load %arg3[%c0_1, %c1] : memref<8x2xf32, #tpu.memory_space<vmem>>, vector<8x1xf32>
    %c0_2 = arith.constant 0 : index
    %c0_3 = arith.constant 0 : index
    %c0_4 = arith.constant 0 : index
    %2 = vector.load %arg1[%c0_2, %c0_3, %c0_4] : memref<2x4x16xf32, #tpu.memory_space<vmem>>, vector<1x4x16xf32>
    %3 = vector.shape_cast %2 : vector<1x4x16xf32> to vector<4x16xf32>
    %4 = arith.truncf %3 : vector<4x16xf32> to vector<4x16xbf16>
    %cst = arith.constant 0.000000e+00 : bf16
    %5 = vector.broadcast %cst : bf16 to vector<4x1xbf16>
    %6 = vector.extract_strided_slice %4 {offsets = [0, 0], sizes = [4, 15], strides = [1, 1]} : vector<4x16xbf16> to vector<4x15xbf16>
    %7 = tpu.concatenate %5, %6 in 1 : vector<4x1xbf16>, vector<4x15xbf16> -> vector<4x16xbf16>
    %8 = vector.extract_strided_slice %4 {offsets = [0, 1], sizes = [4, 15], strides = [1, 1]} : vector<4x16xbf16> to vector<4x15xbf16>
    %cst_5 = arith.constant 0.000000e+00 : bf16
    %9 = vector.broadcast %cst_5 : bf16 to vector<4x1xbf16>
    %10 = tpu.concatenate %8, %9 in 1 : vector<4x15xbf16>, vector<4x1xbf16> -> vector<4x16xbf16>
    %11 = tpu.concatenate %7, %4, %10 in 0 : vector<4x16xbf16>, vector<4x16xbf16>, vector<4x16xbf16> -> vector<12x16xbf16>
    %c0_6 = arith.constant 0 : index
    %c0_7 = arith.constant 0 : index
    %12 = vector.load %arg2[%c0_6, %c0_7] : memref<8x12xbf16, #tpu.memory_space<vmem>>, vector<8x12xbf16>
    %cst_8 = arith.constant dense<0.000000e+00> : vector<8x16xf32>
    %13 = tpu.matmul %12, %11, %cst_8 {dimension_numbers = #tpu.dot_dimension_numbers<[1], [0], [0], [1], [0, 0, 1, 1], [], []>} : vector<8x12xbf16>, vector<12x16xbf16>, vector<8x16xf32> -> vector<8x16xf32>
    %14 = vector.broadcast %0 : vector<8x1xf32> to vector<8x16xf32>
    %15 = arith.mulf %13, %14 : vector<8x16xf32>
    %16 = vector.broadcast %1 : vector<8x1xf32> to vector<8x16xf32>
    %17 = arith.addf %15, %16 : vector<8x16xf32>
    %c0_9 = arith.constant 0 : index
    %c0_10 = arith.constant 0 : index
    %c0_11 = arith.constant 0 : index
    %18 = vector.load %arg4[%c0_9, %c0_10, %c0_11] : memref<2x8x16xf32, #tpu.memory_space<vmem>>, vector<1x8x16xf32>
    %19 = vector.shape_cast %18 : vector<1x8x16xf32> to vector<8x16xf32>
    %20 = vector.shape_cast %17 : vector<8x16xf32> to vector<1x8x16xf32>
    tpu.vector_store %arg4[%c0_9, %c0_10, %c0_11], %20 {strides = array<i32>} : memref<2x8x16xf32, #tpu.memory_space<vmem>>, vector<1x8x16xf32>,
    %c1_12 = arith.constant 1 : index
    %c0_13 = arith.constant 0 : index
    %c0_14 = arith.constant 0 : index
    %21 = vector.load %arg1[%c1_12, %c0_13, %c0_14] : memref<2x4x16xf32, #tpu.memory_space<vmem>>, vector<1x4x16xf32>
    %22 = vector.shape_cast %21 : vector<1x4x16xf32> to vector<4x16xf32>
    %23 = arith.truncf %22 : vector<4x16xf32> to vector<4x16xbf16>
    %cst_15 = arith.constant 0.000000e+00 : bf16
    %24 = vector.broadcast %cst_15 : bf16 to vector<4x1xbf16>
    %25 = vector.extract_strided_slice %23 {offsets = [0, 0], sizes = [4, 15], strides = [1, 1]} : vector<4x16xbf16> to vector<4x15xbf16>
    %26 = tpu.concatenate %24, %25 in 1 : vector<4x1xbf16>, vector<4x15xbf16> -> vector<4x16xbf16>
    %27 = vector.extract_strided_slice %23 {offsets = [0, 1], sizes = [4, 15], strides = [1, 1]} : vector<4x16xbf16> to vector<4x15xbf16>
    %cst_16 = arith.constant 0.000000e+00 : bf16
    %28 = vector.broadcast %cst_16 : bf16 to vector<4x1xbf16>
    %29 = tpu.concatenate %27, %28 in 1 : vector<4x15xbf16>, vector<4x1xbf16> -> vector<4x16xbf16>
    %30 = tpu.concatenate %26, %23, %29 in 0 : vector<4x16xbf16>, vector<4x16xbf16>, vector<4x16xbf16> -> vector<12x16xbf16>
    %c0_17 = arith.constant 0 : index
    %c0_18 = arith.constant 0 : index
    %31 = vector.load %arg2[%c0_17, %c0_18] : memref<8x12xbf16, #tpu.memory_space<vmem>>, vector<8x12xbf16>
    %cst_19 = arith.constant dense<0.000000e+00> : vector<8x16xf32>
    %32 = tpu.matmul %31, %30, %cst_19 {dimension_numbers = #tpu.dot_dimension_numbers<[1], [0], [0], [1], [0, 0, 1, 1], [], []>} : vector<8x12xbf16>, vector<12x16xbf16>, vector<8x16xf32> -> vector<8x16xf32>
    %33 = vector.broadcast %0 : vector<8x1xf32> to vector<8x16xf32>
    %34 = arith.mulf %32, %33 : vector<8x16xf32>
    %35 = vector.broadcast %1 : vector<8x1xf32> to vector<8x16xf32>
    %36 = arith.addf %34, %35 : vector<8x16xf32>
    %c1_20 = arith.constant 1 : index
    %c0_21 = arith.constant 0 : index
    %c0_22 = arith.constant 0 : index
    %37 = vector.load %arg4[%c1_20, %c0_21, %c0_22] : memref<2x8x16xf32, #tpu.memory_space<vmem>>, vector<1x8x16xf32>
    %38 = vector.shape_cast %37 : vector<1x8x16xf32> to vector<8x16xf32>
    %39 = vector.shape_cast %36 : vector<8x16xf32> to vector<1x8x16xf32>
    tpu.vector_store %arg4[%c1_20, %c0_21, %c0_22], %39 {strides = array<i32>} : memref<2x8x16xf32, #tpu.memory_space<vmem>>, vector<1x8x16xf32>,
    return
  }
  func.func @transform_0(%arg0: i32) -> (i32, i32, i32) {
    %c0_i32 = arith.constant 0 : i32
    %c0_i32_0 = arith.constant 0 : i32
    %c0_i32_1 = arith.constant 0 : i32
    return %arg0, %c0_i32, %c0_i32_0 : i32, i32, i32
  }
  func.func @transform_1(%arg0: i32) -> (i32, i32) {
    %c0_i32 = arith.constant 0 : i32
    %c0_i32_0 = arith.constant 0 : i32
    %c0_i32_1 = arith.constant 0 : i32
    return %c0_i32, %c0_i32_0 : i32, i32
  }
  func.func @transform_2(%arg0: i32) -> (i32, i32) {
    %c0_i32 = arith.constant 0 : i32
    %c0_i32_0 = arith.constant 0 : i32
    %c0_i32_1 = arith.constant 0 : i32
    return %c0_i32, %c0_i32_0 : i32, i32
  }
  func.func @transform_3(%arg0: i32) -> (i32, i32, i32) {
    %c0_i32 = arith.constant 0 : i32
    %c0_i32_0 = arith.constant 0 : i32
    %c0_i32_1 = arith.constant 0 : i32
    return %arg0, %c0_i32, %c0_i32_0 : i32, i32, i32
  }
}

</mosaic_0001>

<bundles_post_ra>
// kernel: conv_bn_1d.2
= control target key start
LH: loop header
LB: loop body
LE: loop exit
PB: predicated region body
PF: predicated region fallthrough
CT: control target
= control target key end

     0   :  { %v203_v2 = vmov 0.0   ;;  %vm204_vm0 = vmmov 0   ;;  %s205_s13 = smov 127   ;;  %s206_s14 = smov 1   ;;  %vm29_vm1 = vcmask 121856   ;;  %vm23_vm2 = vcmask 7168   ;;  %s264_s0 = inlined_call_operand.vmem [shape: f32[2,4,16], index: 0, kind: input, shape index: {}]   ;;  %s265_s1 = inlined_call_operand.vmem [shape: bf16[8,12], index: 1, kind: input, shape index: {}]   ;;  %s266_s2 = inlined_call_operand.vmem [shape: f32[8,2], index: 2, kind: output, shape index: {}]  }
   0x1   :  { %v18_v0 = vld [vmem:[%s264_s0] sm:$0xf]  ;;  %v181_v1 = vld [vmem:[%s264_s0 + $0x4] sm:$0xf]  ;;  %187 = vmatprep.subr.bf16.mxu0 %v203_v2  ;;  %193 = vmatprep.subr.bf16.mxu1 %v203_v2  ;;  %vm35_vm3 = vcmask 1041408   ;;  %vm38_vm4 = vcmask 1043456  }
   0x2   :  { %v19_v3 = vpack.c.bf16 %v18_v0, %v18_v0  ;;  %189 = vmatprep.mubr.msk.bf16.mxu0 %vm204_vm0, %v203_v2  ;;  %195 = vmatprep.mubr.msk.bf16.mxu1 %vm204_vm0, %v203_v2  ;;  %v101_v4 = vpack.c.bf16 %v181_v1, %v181_v1  ;;  %vm46_vm5 = vcmask 1045504   ;;  %v41_v21 = vld [vmem:[%s265_s1] sm:$0xf]  ;;  %vm42_vm6 = vcmask 97280  }
   0x3   :  { %vm89_vm7 = vcmask 130048   ;;  %vm16_vm8 = vcmask 15360   ;;  %vm174_vm9 = vcmask 15368  }
   0x4   :  { %27 = vrot.lane.b32.xlu0 %v19_v3, %s205_s13  ;;  %21 = vrot.lane.b32.xlu1 %v19_v3, %s206_s14  ;;  %v32_v5 = vrot.slane %v19_v3, 6  ;;  %v111_v12 = vrot.slane %v101_v4, 6  ;;  %17 = vst.msk [vmem:[%s266_s2] sm:$0xff] %vm16_vm8, %v203_v2 }
   0x8   :  { %107 = vrot.lane.b32.xlu0 %v101_v4, %s205_s13  ;;  %103 = vrot.lane.b32.xlu1 %v101_v4, %s206_s14 }
   0xb   :  { %v169_v39 = vld [vmem:[%s266_s2] sm:$0xff] }
  0x76   :  { %v28_v6 = vpop.permute.xlu0 %27  ;;  %v22_v7 = vpop.permute.xlu1 %21 }
  0x77   :  { %v31_v8 = vsel %vm29_vm1, %v28_v6, 0  ;;  %v26_v9 = vsel %vm23_vm2, 0, %v22_v7 }
  0x78   :  { %v34_v10 = vrot.slane %v31_v8, 4  ;;  %v37_v11 = vsel %vm35_vm3, %v26_v9, %v32_v5 }
  0x7a   :  { %v108_v13 = vpop.permute.xlu0 %107  ;;  %v104_v14 = vpop.permute.xlu1 %103  ;;  %v40_v15 = vsel %vm38_vm4, %v37_v11, %v34_v10 }
  0x7b   :  { %v110_v16 = vsel %vm29_vm1, %v108_v13, 0  ;;  %v106_v17 = vsel %vm23_vm2, 0, %v104_v14  ;;  %v47_v18 = vsel %vm46_vm5, %v40_v15, 0 }
  0x7c   :  { %v113_v19 = vrot.slane %v110_v16, 4  ;;  %v115_v20 = vsel %vm35_vm3, %v106_v17, %v111_v12  ;;  %188 = vmatpush3.bf16.msra.mxu0 %v47_v18 }
  0x7e   :  { %v117_v22 = vsel %vm38_vm4, %v115_v20, %v113_v19 }
  0x7f   :  { %190 = vmatmul.mubr.msk.bf16.vlgmr.msra.gmra.mrb[0].mxu0 %vm42_vm6, %v41_v21  ;;  %v118_v23 = vsel %vm46_vm5, %v117_v22, 0 }
  0x80   :  { %194 = vmatpush3.bf16.msra.mxu1 %v118_v23 }
  0x83   :  { %196 = vmatmul.mubr.msk.bf16.vlgmr.msra.gmra.mrb[0].mxu1 %vm42_vm6, %v41_v21 }
 0x152   :  { %v83_v24 = vpop.f32.mrb[0].mxu0 }
 0x153   :  { %v94_v25 = vmul.f32 %v83_v24, %v83_v24  ;;  %v90_v26 = vsel %vm89_vm7, %v83_v24, 0.0  ;;  %v191_v27 = vpop.f32.mrb[1].mxu0 }
 0x154   :  { %91 = vadd.xlane.f32.xlu0 %v90_v26  ;;  %v86_v28 = vpop.f32.mrb[2].mxu0 }
 0x155   :  { %v192_v29 = vpop.f32.mrb[3].mxu0  ;;  %v95_v30 = vsel %vm89_vm7, %v94_v25, 0.0 }
 0x156   :  { %v154_v31 = vpop.f32.mrb[0].mxu1 }
 0x157   :  { %v164_v32 = vmul.f32 %v154_v31, %v154_v31  ;;  %v197_v33 = vpop.f32.mrb[1].mxu1  ;;  %v160_v34 = vsel %vm89_vm7, %v154_v31, 0.0 }
 0x158   :  { %161 = vadd.xlane.f32.xlu1 %v160_v34  ;;  %v157_v35 = vpop.f32.mrb[2].mxu1  ;;  %96 = vadd.xlane.f32.xlu0 %v95_v30 }
 0x159   :  { %v198_v36 = vpop.f32.mrb[3].mxu1  ;;  %v165_v37 = vsel %vm89_vm7, %v164_v32, 0.0 }
 0x15c   :  { %166 = vadd.xlane.f32.xlu0 %v165_v37 }
 0x1e1   :  { %v92_v38 = vpop.xlane.xlu0 %91 }
 0x1e5   :  { %v162_v40 = vpop.xlane.xlu1 %161  ;;  %v97_v42 = vpop.xlane.xlu0 %96 }
 0x1e6   :  { %v163_v41 = vadd.f32 %v162_v40, %v92_v38 }
 0x1e8   :  { %v170_v43 = vadd.f32 %v169_v39, %v163_v41 }
 0x1e9   :  { %v167_v44 = vpop.xlane.xlu0 %166 }
 0x1ea   :  { %171 = vst.msk [vmem:[%s266_s2] sm:$0xff] %vm23_vm2, %v170_v43  ;;  %v168_v45 = vadd.f32 %v167_v44, %v97_v42 }
 0x1f1   :  { %v172_v46 = vld [vmem:[%s266_s2] sm:$0xff] }
 0x1f2   :  { %v173_v47 = vadd.f32 %v172_v46, %v168_v45 }
 0x1f4   :  { %175 = vst.msk [vmem:[%s266_s2] sm:$0xff] %vm174_vm9, %v173_v47 }

// kernel: conv_bn_1d.3
= control target key start
LH: loop header
LB: loop body
LE: loop exit
PB: predicated region body
PF: predicated region fallthrough
CT: control target
= control target key end

     0   :  { %s241_s16 = smov 127   ;;  %s242_s17 = smov 1   ;;  %s305_s0 = inlined_call_operand.vmem [shape: f32[2,4,16], index: 0, kind: input, shape index: {}]   ;;  %s306_s1 = inlined_call_operand.vmem [shape: bf16[8,12], index: 1, kind: input, shape index: {}]   ;;  %s307_s2 = inlined_call_operand.vmem [shape: f32[8,2], index: 2, kind: input, shape index: {}]   ;;  %s308_s3 = inlined_call_operand.hbm [shape: f32[2,8,16], index: 3, kind: output, shape index: {}]  }
   0x1   :  { %v17_v0 = vld [vmem:[%s305_s0] sm:$0xf]  ;;  %v187_v1 = vld [vmem:[%s305_s0 + $0x4] sm:$0xf] }
   0x2   :  { %v18_v2 = vpack.c.bf16 %v17_v0, %v17_v0  ;;  %v103_v3 = vpack.c.bf16 %v187_v1, %v187_v1 }
   0x4   :  { %26 = vrot.lane.b32.xlu0 %v18_v2, %s241_s16  ;;  %20 = vrot.lane.b32.xlu1 %v18_v2, %s242_s17 }
   0x5   :  { %8 = vsyncpa [#allocation3], 0  ;;  %v243_v4 = vmov 0.0   ;;  %vm244_vm0 = vmmov 0   ;;  %v245_v5 = vmov 0   ;;  %v246_v6 = vmov 1  }
   0x6   :  { %193 = vmatprep.subr.bf16.mxu0 %v243_v4  ;;  %195 = vmatprep.mubr.msk.bf16.mxu0 %vm244_vm0, %v243_v4  ;;  %v16_v7 = vld [vmem:[%s307_s2] sm:$0xff]  ;;  %vm28_vm1 = vcmask 121856   ;;  %vm22_vm2 = vcmask 7168   ;;  %v31_v8 = vrot.slane %v18_v2, 6  ;;  %vm34_vm3 = vcmask 1041408   ;;  %s247_s22 = smov [#allocation2]  }
   0x7   :  { %199 = vmatprep.subr.bf16.mxu1 %v243_v4  ;;  %201 = vmatprep.mubr.msk.bf16.mxu1 %vm244_vm0, %v243_v4  ;;  %vm37_vm4 = vcmask 1043456   ;;  %v113_v15 = vrot.slane %v103_v3, 6  ;;  %vm45_vm5 = vcmask 1045504   ;;  %v40_v24 = vld [vmem:[%s306_s1] sm:$0xf]  ;;  %vm41_vm6 = vcmask 97280  }
   0x8   :  { %214 = vset.pattern.permute.xlu0 %v245_v5  ;;  %215 = vset.pattern.permute.xlu1 %v246_v6  ;;  %v120_v27 = vld [vmem:[%s306_s1] sm:$0xf]  ;;  %vm99_vm7 = vcmask 130048   ;;  %s175_s23 = sshll.u32 %s247_s22, 4  ;;  %s176_s23 = int_to_ptr.vmem [resolvable:$true] %s175_s23 }
   0x9   :  { %109 = vrot.lane.b32.xlu0 %v103_v3, %s241_s16  ;;  %105 = vrot.lane.b32.xlu1 %v103_v3, %s242_s17  ;;  %s217_s1 = scalar_lea.vmem %s176_s23, 256  ;;  %p222_p1 = scmp.lt.s32.totalorder %s176_s23, %s176_s23 }
   0xa   :  { %p218_p0 = scmp.ne.s32.totalorder %s176_s23, %s217_s1  ;;  %p223_p2 = scmp.lt.s32.totalorder %s217_s1, %s217_s1 }
   0xc   :  { %p224_p3 = por %p223_p2, %p222_p1 }
   0xd   :  { %90 = vperm.xlu0 %214, %v16_v7   ;;  %95 = vperm.xlu1 %215, %v16_v7  }
   0xe   :  { %p225_p4 = pnand %p224_p3, %p218_p0 }
  0x11   :  { %216 = vset.pattern.permute.xlu0 %v246_v6 }
  0x76   :  { %v27_v9 = vpop.permute.xlu0 %26  ;;  %v21_v10 = vpop.permute.xlu1 %20 }
  0x77   :  { %v30_v11 = vsel %vm28_vm1, %v27_v9, 0  ;;  %v25_v12 = vsel %vm22_vm2, 0, %v21_v10 }
  0x78   :  { %v33_v13 = vrot.slane %v30_v11, 4  ;;  %v36_v14 = vsel %vm34_vm3, %v25_v12, %v31_v8 }
  0x7a   :  { %v39_v18 = vsel %vm37_vm4, %v36_v14, %v33_v13 }
  0x7b   :  { %v110_v16 = vpop.permute.xlu0 %109  ;;  %v106_v17 = vpop.permute.xlu1 %105  ;;  %v46_v21 = vsel %vm45_vm5, %v39_v18, 0 }
  0x7c   :  { %v112_v19 = vsel %vm28_vm1, %v110_v16, 0  ;;  %v108_v20 = vsel %vm22_vm2, 0, %v106_v17  ;;  %194 = vmatpush3.bf16.msra.mxu0 %v46_v21 }
  0x7d   :  { %v115_v22 = vrot.slane %v112_v19, 4  ;;  %v117_v23 = vsel %vm34_vm3, %v108_v20, %v113_v15 }
  0x7f   :  { %v119_v25 = vsel %vm37_vm4, %v117_v23, %v115_v22  ;;  %196 = vmatmul.mubr.msk.bf16.vlgmr.msra.gmra.mrb[0].mxu0 %vm41_vm6, %v40_v24 }
  0x80   :  { %v124_v26 = vsel %vm45_vm5, %v119_v25, 0 }
  0x81   :  { %200 = vmatpush3.bf16.msra.mxu1 %v124_v26 }
  0x84   :  { %202 = vmatmul.mubr.msk.bf16.vlgmr.msra.gmra.mrb[0].mxu1 %vm41_vm6, %v120_v27 }
  0x8c   :  { %v91_v28 = vpop.permute.xlu0 %90  ;;  %v96_v30 = vpop.permute.xlu1 %95 }
 0x152   :  { %v82_v29 = vpop.f32.mrb[0].mxu0 }
 0x153   :  { %v197_v31 = vpop.f32.mrb[1].mxu0  ;;  %v93_v32 = vmul.f32 %v91_v28, %v82_v29 }
 0x154   :  { %v85_v33 = vpop.f32.mrb[2].mxu0 }
 0x155   :  { %v198_v34 = vpop.f32.mrb[3].mxu0  ;;  %v98_v35 = vadd.f32 %v96_v30, %v93_v32 }
 0x157   :  { %v160_v36 = vpop.f32.mrb[0].mxu1  ;;  %100 = vst.msk [vmem:[#allocation2] sm:$0xff] %vm99_vm7, %v98_v35 }
 0x158   :  { %v166_v37 = vmul.f32 %v160_v36, %v91_v28  ;;  %v203_v38 = vpop.f32.mrb[1].mxu1 }
 0x159   :  { %v163_v39 = vpop.f32.mrb[2].mxu1 }
 0x15a   :  { %v167_v40 = vadd.f32 %v166_v37, %v96_v30  ;;  %v204_v41 = vpop.f32.mrb[3].mxu1 }
 0x15c   :  { %169 = vst.msk [vmem:[#allocation2 + $0x8] sm:$0xff] %vm99_vm7, %v167_v40 }
 0x15d   :  { %228 = shalt.err (!%p225_p4)
}
 0x15e   :  { %s229_s26 = scalar_lea.hbm %s308_s3, 256 }
 0x15f   :  { %p230_p5 = scmp.ne.s32.totalorder %s308_s3, %s229_s26  ;;  %p233_p6 = scmp.lt.u32.totalorder %s229_s26, %s308_s3 }
 0x161   :  { %p235_p7 = pnand %p233_p6, %p230_p5 }
 0x163   :  { %238 = shalt.err (!%p235_p7)
}
 0x164   :  { %s248_s4 = smov 128   ;;  %s249_s5 = smov 8  }
 0x165   :  { %181 = dma.vmem_to_hbm [thread:$0]  %s176_s23, 256, %s308_s3, [#allocation3], %s248_s4, %s248_s4, %s249_s5  }
 0x166   :  { %239 = dma.done.wait [#allocation3], 256  }
 0x167   :  { %240 = vsyncadd [#allocation3], 4294967040 }
 0x168   :  { %185 = vsyncpa [#allocation3], 1 }

</bundles_post_ra>
